<compile_context>
chip_gen: v7x
topology: tpu7x:2x2x1
jax: 0.10.0
libtpu: 0.0.40
codegen_flags: <defaults>
</compile_context>

<pallas_src>
import math

import jax
import jax.numpy as jnp
from jax import lax
from jax.experimental import pallas as pl
from jax.experimental.pallas import tpu as pltpu


def prepare_params(params, state_dim, emb_dim):
    """One-time parameter fusion (hoisted out of the per-call hot path)."""
    ws, bs, wq, wk, wv, wo, bo = params
    E, S = emb_dim, state_dim
    # TODO(synk): state_dim == 0 branch of the PyTorch module not implemented.
    assert S > 0, "state_dim == 0 path not implemented"
    f32 = jnp.float32
    wq = wq.astype(f32); wk = wk.astype(f32); wv = wv.astype(f32)
    ws = ws.astype(f32); bs = bs.astype(f32)

    wq_state = wq[2 * E:3 * E]                       # [E, E]
    # Fold init_linear_state into w_q (state_emb only feeds q).
    ws_q = ws @ wq_state                             # [S, E]
    bs_q = bs @ wq_state                             # [E]

    # Fused input projection: [curr | next | state] @ w_in + b_in = [q | curr_v]
    w_in = jnp.zeros((2 * E + S, 2 * E), f32)
    w_in = w_in.at[0:E, 0:E].set(wq[0:E])            # curr -> q
    w_in = w_in.at[E:2 * E, 0:E].set(wq[E:2 * E])    # next -> q
    w_in = w_in.at[2 * E:, 0:E].set(ws_q)            # state -> q (folded)
    w_in = w_in.at[0:E, E:2 * E].set(wv[0:E])        # curr -> deferred v
    b_in = jnp.concatenate([bs_q, jnp.zeros((E,), f32)]).reshape(1, 2 * E)

    # Fused node projection: node @ w_node = [k_node | v_node]
    # (curr's K contribution cancels in softmax; its V part is deferred.)
    w_node = jnp.concatenate([wk[E:2 * E], wv[E:2 * E]], axis=1)   # [E, 2E]

    return dict(w_in=w_in, b_in=b_in, w_node=w_node,
                wo=wo.astype(f32), bo=bo.astype(f32).reshape(1, E))


def attention_edge_encoder(curr_id, next_id, mask, state, node_emb, prepped,
                           *, batch_block=None):
    """Pallas implementation of AttentionEdgeEncoder.forward (eval mode)."""
    B, N, E = node_emb.shape
    S = state.shape[-1]
    norm_factor = 1.0 / math.sqrt(E)
    f32 = jnp.float32
    NEG = -1e30   # large finite sentinel; fully-masked rows stay NaN-free

    # Single grid step by default: on 1-TC chips (v5e/v6e) the grid is a
    # sequential loop, so splitting only adds ~0.35us/step with no gain.
    # TODO(synk): gate a 2-way batch split on multi-TensorCore chips (v7x)
    # for large 8-aligned B (pad B so bb % 8 == 0 and bb*N % 128 == 0).
    bb = B if batch_block is None else batch_block
    assert B % bb == 0, "batch_block must divide batch size"
    if bb != B:
        assert bb % 8 == 0 and (bb * N) % 128 == 0, \
            "batch_block must keep all block shapes (8,128)-aligned"
    num_blocks = B // bb

    node_flat = node_emb.reshape(B * N, E).astype(f32)              # [B*N, E]
    ids = jnp.stack([curr_id, next_id], axis=1).astype(jnp.int32)   # [B, 2]
    # Additive mask bias (0 valid / -1e30 masked), flattened along lanes.
    mask_bias = jnp.where(mask, 0.0, NEG).astype(f32).reshape(1, B * N)
    state_in = state.astype(f32)

    w_in, b_in, w_node = prepped["w_in"], prepped["b_in"], prepped["w_node"]
    wo, bo = prepped["wo"], prepped["bo"]

    def kernel(ids_ref, node_ref, mbias_ref, state_ref,
               w_in_ref, b_in_ref, w_node_ref, wo_ref, bo_ref, out_ref):
        node = node_ref[...]                                        # [bb*N, E]
        ids_blk = ids_ref[...]                                      # [bb, 2]

        # ---- gather curr/next rows via one-hot MXU matmuls ----------------
        row = lax.broadcasted_iota(jnp.int32, (bb, bb * N), 0)      # batch row
        col = lax.broadcasted_iota(jnp.int32, (bb, bb * N), 1)      # flat node
        base = row * N
        oh_curr = (col == base + ids_blk[:, 0:1]).astype(f32)       # [bb, bb*N]
        oh_next = (col == base + ids_blk[:, 1:2]).astype(f32)
        curr_emb = jnp.dot(oh_curr, node, preferred_element_type=f32)   # [bb, E]
        next_emb = jnp.dot(oh_next, node, preferred_element_type=f32)   # [bb, E]

        # ---- fused input projection: one wide push -> [q | curr_v] --------
        input_cat = jnp.concatenate(
            [curr_emb, next_emb, state_ref[...]], axis=1)           # [bb, 2E+S]
        qcv = (jnp.dot(input_cat, w_in_ref[...], preferred_element_type=f32)
               + b_in_ref[...])                                     # [bb, 2E]
        q = qcv[:, 0:E]                                             # [bb, E]
        curr_v = qcv[:, E:2 * E]                                    # deferred v

        # ---- fused node projection: [k_node | v_node] ----------------------
        node_proj = jnp.dot(node, w_node_ref[...],
                            preferred_element_type=f32)             # [bb*N, 2E]
        k_node = node_proj[:, 0:E]
        v_node = node_proj[:, E:2 * E]

        # ---- single-query attention as flat 2-D matmuls --------------------
        logits = norm_factor * lax.dot_general(
            q, k_node, (((1,), (1,)), ((), ())),
            preferred_element_type=f32)                             # [bb, bb*N]
        own = jnp.logical_and(col >= base, col < base + N)          # block diag
        compat = logits + jnp.where(own, mbias_ref[...], NEG)
        m = jnp.max(compat, axis=-1, keepdims=True)
        p = jnp.exp(compat - m)
        denom = jnp.sum(p, axis=-1, keepdims=True)
        attn = p * pl.reciprocal(denom, approx=True)                # EUP divide
        h = jnp.dot(attn, v_node, preferred_element_type=f32) + curr_v  # [bb, E]

        out = jnp.dot(h, wo_ref[...], preferred_element_type=f32) + bo_ref[...] + q
        out_ref[...] = out.astype(out_ref.dtype)

    # Generation-aware VMEM cap: footprint of all (double-buffered) blocks
    # plus headroom, clamped under v7x's 64 MiB physical budget.
    def _nbytes(shape):
        n = 1
        for d in shape:
            n *= d
        return 4 * n
    blk_bytes = sum(_nbytes(s) for s in [
        (bb, 2), (bb * N, E), (1, bb * N), (bb, S),
        (2 * E + S, 2 * E), (1, 2 * E), (E, 2 * E), (E, E), (1, E), (bb, E)])
    vmem_limit = int(min(max(4 * blk_bytes, 8 << 20), 48 << 20))

    grid_spec = pltpu.PrefetchScalarGridSpec(
        num_scalar_prefetch=0,
        grid=(num_blocks,),
        in_specs=[
            pl.BlockSpec((bb, 2), lambda b: (b, 0)),               # curr/next ids
            pl.BlockSpec((bb * N, E), lambda b: (b, 0)),           # node slab
            pl.BlockSpec((1, bb * N), lambda b: (0, b)),           # mask bias
            pl.BlockSpec((bb, S), lambda b: (b, 0)),               # state
            pl.BlockSpec((2 * E + S, 2 * E), lambda b: (0, 0)),    # w_in (fused)
            pl.BlockSpec((1, 2 * E), lambda b: (0, 0)),            # b_in
            pl.BlockSpec((E, 2 * E), lambda b: (0, 0)),            # w_node (fused)
            pl.BlockSpec((E, E), lambda b: (0, 0)),                # wo
            pl.BlockSpec((1, E), lambda b: (0, 0)),                # bo
        ],
        # TODO(synk): for bb*E that is a large multiple of 128, present a
        # lane-dense ((bb*E)//128, 128) output slab instead of (bb, E=32).
        out_specs=pl.BlockSpec((bb, E), lambda b: (b, 0)),
    )

    out = pl.pallas_call(
        kernel,
        out_shape=jax.ShapeDtypeStruct((B, E), f32),
        grid_spec=grid_spec,
        compiler_params=pltpu.CompilerParams(
            dimension_semantics=("parallel",),
            vmem_limit_bytes=vmem_limit),
    )(ids, node_flat, mask_bias, state_in, w_in, b_in, w_node, wo, bo)
    return out


def reference(curr_id, next_id, mask, state, node_emb, params):
    """Pure-JAX reference matching the PyTorch forward (eval mode)."""
    ws, bs, wq, wk, wv, wo, bo = params
    B, N, E = node_emb.shape
    norm_factor = 1.0 / math.sqrt(E)
    batch_idx = jnp.arange(B)
    curr_emb = node_emb[batch_idx, curr_id]                       # [B, E]
    next_emb = node_emb[batch_idx, next_id]                       # [B, E]
    state_emb = state @ ws + bs                                   # [B, E]
    input_q = jnp.concatenate([curr_emb, next_emb, state_emb], -1)[:, None, :]
    input_kv = jnp.concatenate(
        [jnp.broadcast_to(curr_emb[:, None, :], node_emb.shape), node_emb], -1)
    q = input_q @ wq                                              # [B, 1, E]
    k = input_kv @ wk                                             # [B, N, E]
    v = input_kv @ wv
    compat = norm_factor * jnp.einsum('bqe,bke->bqk', q, k)
    compat = jnp.where(mask[:, None, :] != 0, compat, -jnp.inf)
    attn = jax.nn.softmax(compat, axis=-1)
    h = jnp.einsum('bqk,bke->bqe', attn, v)[:, 0]                 # [B, E]
    return h @ wo + bo + q[:, 0]


def init_params(key, state_dim, emb_dim):
    """Deterministic uniform(-1/sqrt(fan), 1/sqrt(fan)) init, mirroring reset_parameters."""
    ks = jax.random.split(key, 7)

    def unif(k, shape, fan):
        s = 1.0 / math.sqrt(fan)
        return jax.random.uniform(k, shape, jnp.float32, minval=-s, maxval=s)

    ws = unif(ks[0], (state_dim, emb_dim), state_dim)    # init_linear_state.weight^T
    bs = unif(ks[1], (emb_dim,), emb_dim)                # init_linear_state.bias
    wq = unif(ks[2], (3 * emb_dim, emb_dim), emb_dim)
    wk = unif(ks[3], (2 * emb_dim, emb_dim), emb_dim)
    wv = unif(ks[4], (2 * emb_dim, emb_dim), emb_dim)
    wo = unif(ks[5], (emb_dim, emb_dim), emb_dim)        # out_linear.weight^T
    bo = unif(ks[6], (emb_dim,), emb_dim)                # out_linear.bias
    return (ws, bs, wq, wk, wv, wo, bo)


if __name__ == "__main__":
    B, N, E, S = 4, 8, 32, 8   # batch, num_nodes, emb_dim, state_dim

    key = jax.random.PRNGKey(0)
    k_p, k_node, k_state, k_c, k_n, k_m = jax.random.split(key, 6)

    params = init_params(k_p, S, E)
    node_emb = jax.random.normal(k_node, (B, N, E), jnp.float32)
    state = jax.random.normal(k_state, (B, S), jnp.float32)
    curr_id = jax.random.randint(k_c, (B,), 0, N, jnp.int32)
    next_id = jax.random.randint(k_n, (B,), 0, N, jnp.int32)
    mask = jax.random.bernoulli(k_m, 0.7, (B, N))
    mask = mask.at[:, 0].set(True)   # guarantee at least one valid node per row

    # TODO(synk): nn.Dropout omitted — eval-mode semantics (identity) are reproduced.
    prepped = prepare_params(params, S, E)   # one-time weight fusion (hoisted)

    out = attention_edge_encoder(curr_id, next_id, mask, state, node_emb, prepped)
    out = jax.block_until_ready(out)

    ref = reference(curr_id, next_id, mask, state, node_emb, params)
    assert out.shape == (B, E)
    # Tolerance relaxed vs exact division: softmax normalization uses the
    # approximate EUP reciprocal (pl.reciprocal(..., approx=True)).
    assert jnp.allclose(out, ref, atol=2e-3, rtol=2e-3), \
        f"max abs err {jnp.max(jnp.abs(out - ref))}"

    print("KERNEL_OK")
</pallas_src>

<mosaic_0001>
module attributes {stable_mosaic.version = 11 : i64} {
  func.func @kernel(%arg0: i32, %arg1: memref<4x2xi32, #tpu.memory_space<vmem>>, %arg2: memref<32x32xf32, #tpu.memory_space<vmem>>, %arg3: memref<1x32xf32, #tpu.memory_space<vmem>>, %arg4: memref<4x8xf32, #tpu.memory_space<vmem>>, %arg5: memref<72x64xf32, #tpu.memory_space<vmem>>, %arg6: memref<1x64xf32, #tpu.memory_space<vmem>>, %arg7: memref<32x64xf32, #tpu.memory_space<vmem>>, %arg8: memref<32x32xf32, #tpu.memory_space<vmem>>, %arg9: memref<1x32xf32, #tpu.memory_space<vmem>>, %arg10: memref<4x32xf32, #tpu.memory_space<vmem>>) attributes {dimension_semantics = [#tpu.dimension_semantics<parallel>], iteration_bounds = array<i64: 1>, scalar_prefetch = 0 : i64, scratch_operands = 0 : i64, tpu.core_type = #tpu.core_type<tc>, window_params = [{transform_indices = @transform_0, window_bounds = array<i64: 4, 2>}, {transform_indices = @transform_1, window_bounds = array<i64: 32, 32>}, {transform_indices = @transform_2, window_bounds = array<i64: 1, 32>}, {transform_indices = @transform_3, window_bounds = array<i64: 4, 8>}, {pipeline_mode = #tpu.pipeline_mode<synchronous>, transform_indices = @transform_4, window_bounds = array<i64: 72, 64>}, {pipeline_mode = #tpu.pipeline_mode<synchronous>, transform_indices = @transform_5, window_bounds = array<i64: 1, 64>}, {pipeline_mode = #tpu.pipeline_mode<synchronous>, transform_indices = @transform_6, window_bounds = array<i64: 32, 64>}, {pipeline_mode = #tpu.pipeline_mode<synchronous>, transform_indices = @transform_7, window_bounds = array<i64: 32, 32>}, {pipeline_mode = #tpu.pipeline_mode<synchronous>, transform_indices = @transform_8, window_bounds = array<i64: 1, 32>}, {transform_indices = @transform_9, window_bounds = array<i64: 4, 32>}]} {
    %c0 = arith.constant 0 : index
    %c0_0 = arith.constant 0 : index
    %0 = vector.load %arg2[%c0, %c0_0] : memref<32x32xf32, #tpu.memory_space<vmem>>, vector<32x32xf32>
    %c0_1 = arith.constant 0 : index
    %c0_2 = arith.constant 0 : index
    %1 = vector.load %arg1[%c0_1, %c0_2] : memref<4x2xi32, #tpu.memory_space<vmem>>, vector<4x2xi32>
    %2 = tpu.iota {dimensions = array<i32: 0>} : vector<4x32xi32>
    %3 = tpu.iota {dimensions = array<i32: 1>} : vector<4x32xi32>
    %c8_i32 = arith.constant 8 : i32
    %4 = vector.broadcast %c8_i32 : i32 to vector<4x32xi32>
    %5 = arith.muli %2, %4 : vector<4x32xi32>
    %6 = vector.extract_strided_slice %1 {offsets = [0, 0], sizes = [4, 1], strides = [1, 1]} : vector<4x2xi32> to vector<4x1xi32>
    %7 = vector.broadcast %6 : vector<4x1xi32> to vector<4x32xi32>
    %8 = arith.addi %5, %7 : vector<4x32xi32>
    %9 = arith.cmpi eq, %3, %8 : vector<4x32xi32>
    %10 = arith.extui %9 : vector<4x32xi1> to vector<4x32xi32>
    %11 = arith.sitofp %10 : vector<4x32xi32> to vector<4x32xf32>
    %12 = vector.extract_strided_slice %1 {offsets = [0, 1], sizes = [4, 1], strides = [1, 1]} : vector<4x2xi32> to vector<4x1xi32>
    %13 = vector.broadcast %12 : vector<4x1xi32> to vector<4x32xi32>
    %14 = arith.addi %5, %13 : vector<4x32xi32>
    %15 = arith.cmpi eq, %3, %14 : vector<4x32xi32>
    %16 = arith.extui %15 : vector<4x32xi1> to vector<4x32xi32>
    %17 = arith.sitofp %16 : vector<4x32xi32> to vector<4x32xf32>
    %cst = arith.constant dense<0.000000e+00> : vector<4x32xf32>
    %18 = tpu.matmul %11, %0, %cst {dimension_numbers = #tpu.dot_dimension_numbers<[1], [0], [0], [1], [0, 0, 1, 1], [], []>} : vector<4x32xf32>, vector<32x32xf32>, vector<4x32xf32> -> vector<4x32xf32>
    %cst_3 = arith.constant dense<0.000000e+00> : vector<4x32xf32>
    %19 = tpu.matmul %17, %0, %cst_3 {dimension_numbers = #tpu.dot_dimension_numbers<[1], [0], [0], [1], [0, 0, 1, 1], [], []>} : vector<4x32xf32>, vector<32x32xf32>, vector<4x32xf32> -> vector<4x32xf32>
    %c0_4 = arith.constant 0 : index
    %c0_5 = arith.constant 0 : index
    %20 = vector.load %arg4[%c0_4, %c0_5] : memref<4x8xf32, #tpu.memory_space<vmem>>, vector<4x8xf32>
    %21 = tpu.concatenate %18, %19, %20 in 1 : vector<4x32xf32>, vector<4x32xf32>, vector<4x8xf32> -> vector<4x72xf32>
    %c0_6 = arith.constant 0 : index
    %c0_7 = arith.constant 0 : index
    %22 = vector.load %arg5[%c0_6, %c0_7] : memref<72x64xf32, #tpu.memory_space<vmem>>, vector<72x64xf32>
    %cst_8 = arith.constant dense<0.000000e+00> : vector<4x64xf32>
    %23 = tpu.matmul %21, %22, %cst_8 {dimension_numbers = #tpu.dot_dimension_numbers<[1], [0], [0], [1], [0, 0, 1, 1], [], []>} : vector<4x72xf32>, vector<72x64xf32>, vector<4x64xf32> -> vector<4x64xf32>
    %c0_9 = arith.constant 0 : index
    %c0_10 = arith.constant 0 : index
    %24 = vector.load %arg6[%c0_9, %c0_10] : memref<1x64xf32, #tpu.memory_space<vmem>>, vector<1x64xf32>
    %25 = vector.broadcast %24 : vector<1x64xf32> to vector<4x64xf32>
    %26 = arith.addf %23, %25 : vector<4x64xf32>
    %27 = vector.extract_strided_slice %26 {offsets = [0, 0], sizes = [4, 32], strides = [1, 1]} : vector<4x64xf32> to vector<4x32xf32>
    %28 = vector.extract_strided_slice %26 {offsets = [0, 32], sizes = [4, 32], strides = [1, 1]} : vector<4x64xf32> to vector<4x32xf32>
    %c0_11 = arith.constant 0 : index
    %c0_12 = arith.constant 0 : index
    %29 = vector.load %arg7[%c0_11, %c0_12] : memref<32x64xf32, #tpu.memory_space<vmem>>, vector<32x64xf32>
    %cst_13 = arith.constant dense<0.000000e+00> : vector<32x64xf32>
    %30 = tpu.matmul %0, %29, %cst_13 {dimension_numbers = #tpu.dot_dimension_numbers<[1], [0], [0], [1], [0, 0, 1, 1], [], []>} : vector<32x32xf32>, vector<32x64xf32>, vector<32x64xf32> -> vector<32x64xf32>
    %31 = vector.extract_strided_slice %30 {offsets = [0, 0], sizes = [32, 32], strides = [1, 1]} : vector<32x64xf32> to vector<32x32xf32>
    %32 = vector.extract_strided_slice %30 {offsets = [0, 32], sizes = [32, 32], strides = [1, 1]} : vector<32x64xf32> to vector<32x32xf32>
    %cst_14 = arith.constant dense<0.000000e+00> : vector<4x32xf32>
    %33 = tpu.matmul %27, %31, %cst_14 {dimension_numbers = #tpu.dot_dimension_numbers<[1], [1], [0], [0], [0, 0, 1, 0], [], []>} : vector<4x32xf32>, vector<32x32xf32>, vector<4x32xf32> -> vector<4x32xf32>
    %cst_15 = arith.constant 0.176776692 : f32
    %34 = vector.broadcast %cst_15 : f32 to vector<4x32xf32>
    %35 = arith.mulf %34, %33 : vector<4x32xf32>
    %36 = arith.cmpi sge, %3, %5 : vector<4x32xi32>
    %c8_i32_16 = arith.constant 8 : i32
    %37 = vector.broadcast %c8_i32_16 : i32 to vector<4x32xi32>
    %38 = arith.addi %5, %37 : vector<4x32xi32>
    %39 = arith.cmpi slt, %3, %38 : vector<4x32xi32>
    %40 = arith.andi %36, %39 : vector<4x32xi1>
    %c0_17 = arith.constant 0 : index
    %c0_18 = arith.constant 0 : index
    %41 = vector.load %arg3[%c0_17, %c0_18] : memref<1x32xf32, #tpu.memory_space<vmem>>, vector<1x32xf32>
    %cst_19 = arith.constant -1.000000e+30 : f32
    %42 = vector.shape_cast %41 : vector<1x32xf32> to vector<1x32xf32>
    %43 = vector.broadcast %42 : vector<1x32xf32> to vector<4x32xf32>
    %44 = vector.broadcast %cst_19 : f32 to vector<4x32xf32>
    %45 = arith.select %40, %43, %44 : vector<4x32xi1>, vector<4x32xf32>
    %46 = arith.addf %35, %45 : vector<4x32xf32>
    %cst_20 = arith.constant dense<0xFF800000> : vector<4xf32>
    %47 = vector.multi_reduction <maximumf>, %46, %cst_20 [1] : vector<4x32xf32> to vector<4xf32>
    %48 = vector.shape_cast %47 : vector<4xf32> to vector<4x1xf32>
    %49 = vector.broadcast %48 : vector<4x1xf32> to vector<4x32xf32>
    %50 = arith.subf %46, %49 : vector<4x32xf32>
    %51 = math.exp %50 : vector<4x32xf32>
    %cst_21 = arith.constant dense<0.000000e+00> : vector<4xf32>
    %52 = vector.multi_reduction <add>, %51, %cst_21 [1] : vector<4x32xf32> to vector<4xf32>
    %53 = vector.shape_cast %52 : vector<4xf32> to vector<4x1xf32>
    %54 = tpu.reciprocal %53 {approx = true} : vector<4x1xf32> -> vector<4x1xf32>
    %55 = vector.broadcast %54 : vector<4x1xf32> to vector<4x32xf32>
    %56 = arith.mulf %51, %55 : vector<4x32xf32>
    %cst_22 = arith.constant dense<0.000000e+00> : vector<4x32xf32>
    %57 = tpu.matmul %56, %32, %cst_22 {dimension_numbers = #tpu.dot_dimension_numbers<[1], [0], [0], [1], [0, 0, 1, 1], [], []>} : vector<4x32xf32>, vector<32x32xf32>, vector<4x32xf32> -> vector<4x32xf32>
    %58 = arith.addf %57, %28 : vector<4x32xf32>
    %c0_23 = arith.constant 0 : index
    %c0_24 = arith.constant 0 : index
    %59 = vector.load %arg8[%c0_23, %c0_24] : memref<32x32xf32, #tpu.memory_space<vmem>>, vector<32x32xf32>
    %cst_25 = arith.constant dense<0.000000e+00> : vector<4x32xf32>
    %60 = tpu.matmul %58, %59, %cst_25 {dimension_numbers = #tpu.dot_dimension_numbers<[1], [0], [0], [1], [0, 0, 1, 1], [], []>} : vector<4x32xf32>, vector<32x32xf32>, vector<4x32xf32> -> vector<4x32xf32>
    %c0_26 = arith.constant 0 : index
    %c0_27 = arith.constant 0 : index
    %61 = vector.load %arg9[%c0_26, %c0_27] : memref<1x32xf32, #tpu.memory_space<vmem>>, vector<1x32xf32>
    %62 = vector.broadcast %61 : vector<1x32xf32> to vector<4x32xf32>
    %63 = arith.addf %60, %62 : vector<4x32xf32>
    %64 = arith.addf %63, %27 : vector<4x32xf32>
    %c0_28 = arith.constant 0 : index
    %c0_29 = arith.constant 0 : index
    %65 = vector.load %arg10[%c0_28, %c0_29] : memref<4x32xf32, #tpu.memory_space<vmem>>, vector<4x32xf32>
    tpu.vector_store %arg10[%c0_28, %c0_29], %64 {strides = array<i32>} : memref<4x32xf32, #tpu.memory_space<vmem>>, vector<4x32xf32>,
    return
  }
  func.func @transform_0(%arg0: i32) -> (i32, i32) {
    %c0_i32 = arith.constant 0 : i32
    %c0_i32_0 = arith.constant 0 : i32
    return %arg0, %c0_i32 : i32, i32
  }
  func.func @transform_1(%arg0: i32) -> (i32, i32) {
    %c0_i32 = arith.constant 0 : i32
    %c0_i32_0 = arith.constant 0 : i32
    return %arg0, %c0_i32 : i32, i32
  }
  func.func @transform_2(%arg0: i32) -> (i32, i32) {
    %c0_i32 = arith.constant 0 : i32
    %c0_i32_0 = arith.constant 0 : i32
    return %c0_i32, %arg0 : i32, i32
  }
  func.func @transform_3(%arg0: i32) -> (i32, i32) {
    %c0_i32 = arith.constant 0 : i32
    %c0_i32_0 = arith.constant 0 : i32
    return %arg0, %c0_i32 : i32, i32
  }
  func.func @transform_4(%arg0: i32) -> (i32, i32) {
    %c0_i32 = arith.constant 0 : i32
    %c0_i32_0 = arith.constant 0 : i32
    %c0_i32_1 = arith.constant 0 : i32
    return %c0_i32, %c0_i32_0 : i32, i32
  }
  func.func @transform_5(%arg0: i32) -> (i32, i32) {
    %c0_i32 = arith.constant 0 : i32
    %c0_i32_0 = arith.constant 0 : i32
    %c0_i32_1 = arith.constant 0 : i32
    return %c0_i32, %c0_i32_0 : i32, i32
  }
  func.func @transform_6(%arg0: i32) -> (i32, i32) {
    %c0_i32 = arith.constant 0 : i32
    %c0_i32_0 = arith.constant 0 : i32
    %c0_i32_1 = arith.constant 0 : i32
    return %c0_i32, %c0_i32_0 : i32, i32
  }
  func.func @transform_7(%arg0: i32) -> (i32, i32) {
    %c0_i32 = arith.constant 0 : i32
    %c0_i32_0 = arith.constant 0 : i32
    %c0_i32_1 = arith.constant 0 : i32
    return %c0_i32, %c0_i32_0 : i32, i32
  }
  func.func @transform_8(%arg0: i32) -> (i32, i32) {
    %c0_i32 = arith.constant 0 : i32
    %c0_i32_0 = arith.constant 0 : i32
    %c0_i32_1 = arith.constant 0 : i32
    return %c0_i32, %c0_i32_0 : i32, i32
  }
  func.func @transform_9(%arg0: i32) -> (i32, i32) {
    %c0_i32 = arith.constant 0 : i32
    %c0_i32_0 = arith.constant 0 : i32
    return %arg0, %c0_i32 : i32, i32
  }
}

</mosaic_0001>

<bundles_post_ra>
// kernel: tpu_custom_call.1
= control target key start
LH: loop header
LB: loop body
LE: loop exit
PB: predicated region body
PF: predicated region fallthrough
CT: control target
= control target key end

     0   :  { %v960_v2 = vmov 1   ;;  %v961_v3 = vmov 0.0|0.0   ;;  %s1182_s0 = inlined_call_operand.vmem [shape: s32[4,2], index: 0, kind: input, shape index: {}]   ;;  %s1183_s1 = inlined_call_operand.vmem [shape: f32[32,32], index: 1, kind: input, shape index: {}]   ;;  %s1184_s2 = inlined_call_operand.vmem [shape: f32[1,32], index: 2, kind: input, shape index: {}]   ;;  %s1185_s3 = inlined_call_operand.vmem [shape: f32[4,8], index: 3, kind: input, shape index: {}]   ;;  %s1186_s4 = inlined_call_operand.vmem [shape: f32[72,64], index: 4, kind: input, shape index: {}]   ;;  %s1187_s5 = inlined_call_operand.vmem [shape: f32[1,64], index: 5, kind: input, shape index: {}]   ;;  %s1188_s6 = inlined_call_operand.vmem [shape: f32[32,64], index: 6, kind: input, shape index: {}]   ;;  %s1189_s7 = inlined_call_operand.vmem [shape: f32[32,32], index: 7, kind: input, shape index: {}]   ;;  %s1190_s8 = inlined_call_operand.vmem [shape: f32[1,32], index: 8, kind: input, shape index: {}]   ;;  %s1191_s9 = inlined_call_operand.hbm [shape: f32[4,32], index: 9, kind: output, shape index: {}]  }
   0x1   :  { %v37_v0 = vld [vmem:[%s1182_s0] sm:$0xf]  ;;  %919 = vset.pattern.permute.xlu0 %v960_v2  ;;  %864 = vmatprep.subr.bf16.mxu1 %v961_v3  ;;  %v1029_v4 = vld [vmem:[%s1183_s1 + $0x8] sm:$0xff]  ;;  %v1034_v5 = vld [vmem:[%s1183_s1 + $0x10] sm:$0xff] }
   0x2   :  { %v33_v1 = vld [vmem:[%s1183_s1] sm:$0xff]  ;;  %v1039_v6 = vld [vmem:[%s1183_s1 + $0x18] sm:$0xff]  ;;  %51 = vperm.xlu0 %919, %v37_v0   ;;  %858 = vmatprep.subr.bf16.mxu0 %v961_v3 }
   0x3   :  { %v859_v7 = vpack.c.bf16 %v1029_v4, %v33_v1 }
   0x4   :  { %14 = vsyncpa [#allocation3], 0  ;;  %v862_v8 = vpack.c.bf16 %v1039_v6, %v1034_v5  ;;  %vm962_vm0 = vmmov 0   ;;  %v963_v9 = vmov 0.0   ;;  %v964_v10 = vmov 0   ;;  %v306_v21 = vld [vmem:[%s1188_s6] sm:$0xff] }
   0x5   :  { %866 = vmatpush3.bf16.msra.mxu1 %v859_v7  ;;  %860 = vmatpush3.bf16.msra.mxu0 %v859_v7  ;;  %v38_v11 = vlaneseq  ;;  %vm57_vm1 = vcmask 261120   ;;  %v307_v22 = vld [vmem:[%s1188_s6 + $0x8] sm:$0xff]  ;;  %v308_v23 = vld [vmem:[%s1188_s6 + $0x10] sm:$0xff]  ;;  %v309_v25 = vld [vmem:[%s1188_s6 + $0x18] sm:$0xff]  ;;  %s965_s19 = smov 32   ;;  %s966_s22 = smov 64  }
   0x6   :  { %867 = vmatprep.subr.bf16.mxu1 %v961_v3  ;;  %787 = vmatprep.mubr.msk.f32.mxu1 %vm962_vm0, %v963_v9  ;;  %v882_v24 = vpack.c.bf16 %v307_v22, %v306_v21  ;;  %v216_v26 = vld [vmem:[%s1186_s4] sm:$0xff]  ;;  %v217_v27 = vld [vmem:[%s1186_s4 + $0x8] sm:$0xff]  ;;  %v886_v28 = vpack.c.bf16 %v309_v25, %v308_v23  ;;  %v218_v30 = vld [vmem:[%s1186_s4 + $0x10] sm:$0xff]  ;;  %vm214_vm5 = vcmask 523264   ;;  %vm232_vm6 = vcmask 588800   ;;  %s967_s24 = smov 96  }
   0x7   :  { %920 = vset.pattern.permute.xlu0 %v964_v10  ;;  %861 = vmatprep.subr.bf16.mxu0 %v961_v3  ;;  %v39_v12 = vshrl.u32 %v38_v11, 7  ;;  %v1054_v14 = vand.u32 127, %v38_v11  ;;  %v871_v29 = vpack.c.bf16 %v217_v27, %v216_v26  ;;  %v219_v31 = vld [vmem:[%s1186_s4 + $0x18] sm:$0xff]  ;;  %v220_v33 = vld [vmem:[%s1186_s4 + $0x20] sm:$0xff]  ;;  %v221_v34 = vld [vmem:[%s1186_s4 + $0x28] sm:$0xff]  ;;  %vm506_vm10 = vcmask 257024  }
   0x8   :  { %44 = vperm.xlu0 %920, %v37_v0   ;;  %776 = vmatprep.mubr.msk.f32.mxu0 %vm962_vm0, %v963_v9  ;;  %v874_v32 = vpack.c.bf16 %v219_v31, %v218_v30  ;;  %v877_v35 = vpack.c.bf16 %v221_v34, %v220_v33  ;;  %v222_v36 = vld [vmem:[%s1186_s4 + $0x30] sm:$0xff]  ;;  %v223_v37 = vld [vmem:[%s1186_s4 + $0x38] sm:$0xff]  ;;  %v224_v39 = vld [vmem:[%s1186_s4 + $0x40] sm:$0xff]  ;;  %s968_s12 = smov [#allocation2]  }
   0x9   :  { %869 = vmatpush3.bf16.msra.mxu1 %v862_v8  ;;  %863 = vmatpush3.bf16.msra.mxu0 %v862_v8  ;;  %v1052_v13 = vmul.u32 8, %v39_v12  ;;  %v880_v38 = vpack.c.bf16 %v223_v37, %v222_v36  ;;  %v204_v42 = vld [vmem:[%s1185_s3] sm:$0xf]  ;;  %vm892_vm4 = vmpackc.low %vm57_vm1, %vm57_vm1  ;;  %v607_v12 = vld [vmem:[%s1189_s7 + $0x8] sm:$0xff]  ;;  %s698_s13 = sshll.u32 %s968_s12, 4  ;;  %s699_s13 = int_to_ptr.vmem [resolvable:$true] %s698_s13 }
   0xa   :  { %870 = vmatprep.subr.bf16.mxu0 %v961_v3  ;;  %883 = vmatprep.subr.bf16.mxu1 %v882_v24  ;;  %v710_v57 = vld [vmem:[%s1187_s5] ss:$0 sm:$0xff]  ;;  %v608_v25 = vld [vmem:[%s1189_s7 + $0x10] sm:$0xff]  ;;  %v609_v26 = vld [vmem:[%s1189_s7 + $0x18] sm:$0xff]  ;;  %p941_p1 = scmp.lt.s32.totalorder %s699_s13, %s699_s13 }
   0xb   :  { %v494_v61 = vadd.s32 8, %v1052_v13  ;;  %vm493_vm7 = vcmp.ge.s32.totalorder %v1054_v14, %v1052_v13  ;;  %v721_v62 = vld [vmem:[%s1184_s2] ss:$0 sm:$0xff]  ;;  %v908_v27 = vpack.c.bf16 %v609_v26, %v608_v25 }
   0xc   :  { %931 = vset.pattern.permute.xlu0 %v960_v2  ;;  %v606_v11 = vld [vmem:[%s1189_s7] sm:$0xff]  ;;  %s936_s7 = scalar_lea.vmem %s699_s13, 64 }
   0xd   :  { %vm495_vm8 = vcmp.lt.s32.totalorder %v1054_v14, %v494_v61  ;;  %v723_v31 = vld [vmem:[%s1190_s8] ss:$0 sm:$0xff]  ;;  %p937_p0 = scmp.ne.s32.totalorder %s699_s13, %s936_s7  ;;  %p942_p2 = scmp.lt.s32.totalorder %s936_s7, %s936_s7 }
   0xe   :  { %vm496_vm9 = vmand %vm493_vm7, %vm495_vm8 }
   0xf   :  { %v504_v0 = vsel %vm496_vm9, %v721_v62, -1e+30  ;;  %p943_p3 = por %p942_p2, %p941_p1 }
  0x11   :  { %p944_p4 = pnand %p943_p3, %p937_p0 }
  0x81   :  { %v52_v15 = vpop.permute.xlu0 %51 }
  0x82   :  { %v53_v16 = vadd.s32 %v52_v15, %v1052_v13 }
  0x84   :  { %vm54_vm2 = vcmp.eq.s32.totalorder %v1054_v14, %v53_v16 }
  0x85   :  { %v707_v17 = vsel %vm54_vm2, 1.0, %v963_v9 }
  0x86   :  { %788 = vmatmul.mubr.msk.f32.vlgmr.msra.gmra.mrb[0].mxu1 %vm57_vm1, %v707_v17 }
  0x87   :  { %v45_v18 = vpop.permute.xlu0 %44  ;;  %819 = vmatprep.mubr.msk.f32.mxu1 %vm57_vm1, %v33_v1  ;;  %885 = vmatpush3.bf16.msra.mxu1 %v882_v24 }
  0x88   :  { %v46_v19 = vadd.s32 %v45_v18, %v1052_v13  ;;  %887 = vmatprep.subr.bf16.mxu1 %v886_v28  ;;  %v905_v13 = vpack.c.bf16 %v607_v12, %v606_v11 }
  0x8a   :  { %vm47_vm3 = vcmp.eq.s32.totalorder %v1054_v14, %v46_v19 }
  0x8b   :  { %v706_v20 = vsel %vm47_vm3, 1.0, %v963_v9  ;;  %889 = vmatpush3.bf16.msra.mxu1 %v886_v28 }
  0x8c   :  { %777 = vmatmul.mubr.msk.f32.vlgmr.msra.gmra.mrb[0].mxu0 %vm57_vm1, %v706_v20  ;;  %890 = vmatprep.subr.bf16.mxu1 %v961_v3 }
  0x8d   :  { %808 = vmatprep.mubr.msk.f32.mxu0 %vm962_vm0, %v963_v9  ;;  %872 = vmatpush3.bf16.msra.mxu0 %v871_v29 }
  0x8e   :  { %873 = vmatprep.subr.bf16.mxu0 %v961_v3  ;;  %820 = vmatmul.mubr.msk.f32.vlgmr.msra.gmra.mrb[2].mxu1 %vm57_vm1, %v1029_v4 }
  0x8f   :  { %822 = vmatprep.mubr.msk.f32.mxu1 %vm57_vm1, %v1034_v5 }
  0x91   :  { %875 = vmatpush3.bf16.msra.mxu0 %v874_v32 }
  0x92   :  { %876 = vmatprep.subr.bf16.mxu0 %v961_v3  ;;  %823 = vmatmul.mubr.msk.f32.gmra.mrb[4].mxu1 %vm57_vm1, %v1039_v6 }
  0x93   :  { %833 = vmatprep.mubr.msk.f32.mxu1 %vm962_vm0, %v963_v9 }
  0x95   :  { %878 = vmatpush3.bf16.msra.mxu0 %v877_v35 }
  0x96   :  { %879 = vmatprep.subr.bf16.mxu0 %v961_v3 }
  0x99   :  { %881 = vmatpush3.bf16.msra.mxu0 %v880_v38 }
  0x9a   :  { %806 = vmatprep.subr.mxu0 %v963_v9 }
  0x9d   :  { %807 = vmatpush3.msra.mxu0 %v224_v39 }
  0x9e   :  { %898 = vmatprep.subr.bf16.mxu0 %v961_v3 }
 0x159   :  { %v200_v40 = vpop.f32.mrb[0].mxu1 }
 0x15a   :  { %206 = vrot.lane.b32.xlu1 %v200_v40, %s965_s19  ;;  %v789_v41 = vpop.f32.mrb[1].mxu1 }
 0x15e   :  { %210 = vrot.lane.b32.xlu1 %v204_v42, %s966_s22 }
 0x15f   :  { %v127_v43 = vpop.f32.mrb[0].mxu0 }
 0x160   :  { %v778_v44 = vpop.f32.mrb[1].mxu0 }
 0x161   :  { %v821_v45 = vpop.f32.mrb[2].mxu1 }
 0x162   :  { %v388_v46 = vpop.f32.mrb[3].mxu1 }
 0x163   :  { %v921_v47 = vpack.i.bf16 %v821_v45, %v388_v46  ;;  %v891_v48 = vpack.c.bf16 %v821_v45, %v388_v46 }
 0x165   :  { %893 = vmatpush3.bf16.xpose.msk.msra.mxu1 %vm892_vm4, %v891_v48  ;;  %v824_v49 = vpop.f32.mrb[4].mxu1 }
 0x166   :  { %v398_v50 = vpop.f32.mrb[5].mxu1  ;;  %894 = vmatprep.subr.bf16.mxu1 %v961_v3 }
 0x167   :  { %v926_v51 = vpack.i.bf16 %v824_v49, %v398_v50  ;;  %v895_v52 = vpack.c.bf16 %v824_v49, %v398_v50 }
 0x16d   :  { %897 = vmatpush3.bf16.xpose.msk.msra.mxu1 %vm892_vm4, %v895_v52 }
 0x16e   :  { %904 = vmatprep.subr.bf16.mxu1 %v961_v3 }
 0x1cc   :  { %v207_v53 = vpop.permute.xlu1 %206 }
 0x1cd   :  { %v213_v54 = vsel %vm57_vm1, %v127_v43, %v207_v53 }
 0x1d0   :  { %v211_v55 = vpop.permute.xlu1 %210 }
 0x1d1   :  { %v215_v56 = vsel %vm214_vm5, %v213_v54, %v211_v55 }
 0x1d2   :  { %809 = vmatmul.mubr.msk.f32.vlgmr.msra.gmra.mrb[2].mxu0 %vm232_vm6, %v215_v56 }
 0x1d3   :  { %844 = vmatprep.mubr.msk.f32.mxu0 %vm962_vm0, %v963_v9 }
 0x2a5   :  { %v302_v58 = vpop.f32.mrb[2].mxu0 }
 0x2a6   :  { %v1133_v59 = vadd.f32 %v710_v57, %v302_v58  ;;  %v810_v60 = vpop.f32.mrb[3].mxu0 }
 0x2a8   :  { %834 = vmatmul.mubr.msk.f32.vlgmr.msra.gmra.mrb[6].mxu1 %vm57_vm1, %v1133_v59 }
 0x2a9   :  { %855 = vmatprep.mubr.msk.f32.mxu1 %vm962_vm0, %v963_v9  ;;  %906 = vmatpush3.bf16.msra.mxu1 %v905_v13 }
 0x2aa   :  { %907 = vmatprep.subr.bf16.mxu1 %v961_v3 }
 0x2ad   :  { %909 = vmatpush3.bf16.msra.mxu1 %v908_v27 }
 0x37b   :  { %v488_v63 = vpop.f32.mrb[6].mxu1 }
 0x37c   :  { %v492_v1 = vmul.f32 0.17677669, %v488_v63  ;;  %v835_v2 = vpop.f32.mrb[7].mxu1 }
 0x37e   :  { %v505_v4 = vadd.f32 %v504_v0, %v492_v1 }
 0x380   :  { %v507_v5 = vsel %vm506_vm10, %v505_v4, -inf }
 0x381   :  { %508 = vmax.xlane.f32.xlu1 %v507_v5 }
 0x392   :  { %927 = vrot.lane.b32.xlu1 %v926_v51, %s967_s24 }
 0x396   :  { %530 = vrot.lane.b32.xlu1 %v1133_v59, %s967_s24 }
 0x40e   :  { %v509_v6 = vpop.xlane.xlu1 %508 }
 0x40f   :  { %v510_v7 = vsub.f32 %v505_v4, %v509_v6 }
 0x411   :  { %v511_v8 = vmul.f32 1.442695, %v510_v7 }
 0x412   :  { %v928_v15 = vpop.permute.xlu1 %927 }
 0x413   :  { %932 = vpow2.f32 %v511_v8  ;;  %v930_v19 = vunpack.i.h.bf16 %v928_v15  ;;  %v929_v20 = vunpack.i.l.bf16 %v928_v15 }
 0x415   :  { %v902_v23 = vpack.c.bf16 %v930_v19, %v929_v20 }
 0x416   :  { %v531_v28 = vpop.permute.xlu1 %530 }
 0x41d   :  { %v933_v9 = vpop.eup %932 }
 0x41e   :  { %v513_v10 = vsel %vm506_vm10, %v933_v9, 0.0 }
 0x41f   :  { %514 = vadd.xlane.f32.xlu0 %v513_v10 }
 0x435   :  { %922 = vrot.lane.b32.xlu0 %v921_v47, %s967_s24 }
 0x4ac   :  { %v515_v14 = vpop.xlane.xlu0 %514 }
 0x4ad   :  { %934 = vrcp.f32 %v515_v14 }
 0x4b0   :  { %v923_v16 = vpop.permute.xlu0 %922 }
 0x4b1   :  { %v925_v17 = vunpack.i.h.bf16 %v923_v16  ;;  %v924_v18 = vunpack.i.l.bf16 %v923_v16 }
 0x4b3   :  { %v899_v21 = vpack.c.bf16 %v925_v17, %v924_v18 }
 0x4b5   :  { %900 = vmatpush3.bf16.msra.mxu0 %v899_v21 }
 0x4b6   :  { %901 = vmatprep.subr.bf16.mxu0 %v961_v3 }
 0x4b7   :  { %v935_v22 = vpop.eup %934 }
 0x4b8   :  { %v517_v24 = vmul.f32 %v935_v22, %v933_v9 }
 0x4b9   :  { %903 = vmatpush3.bf16.msra.mxu0 %v902_v23 }
 0x4bc   :  { %845 = vmatmul.mubr.msk.f32.vlgmr.msra.gmra.mrb[4].mxu0 %vm57_vm1, %v517_v24 }
 0x58f   :  { %v602_v29 = vpop.f32.mrb[4].mxu0 }
 0x590   :  { %v603_v30 = vadd.f32 %v602_v29, %v531_v28  ;;  %v846_v3 = vpop.f32.mrb[5].mxu0 }
 0x592   :  { %856 = vmatmul.mubr.msk.f32.vlgmr.msra.gmra.mrb[8].mxu1 %vm57_vm1, %v603_v30 }
 0x665   :  { %v686_v32 = vpop.f32.mrb[8].mxu1 }
 0x666   :  { %v687_v33 = vadd.f32 %v723_v31, %v686_v32  ;;  %v857_v34 = vpop.f32.mrb[9].mxu1 }
 0x668   :  { %v690_v35 = vadd.f32 %v687_v33, %v1133_v59 }
 0x66a   :  { %691 = vst.msk [vmem:[#allocation2] sm:$0xf] %vm506_vm10, %v690_v35 }
 0x66b   :  { %947 = shalt.err (!%p944_p4)
}
 0x66c   :  { %s948_s8 = scalar_lea.hbm %s1191_s9, 64 }
 0x66d   :  { %p949_p5 = scmp.ne.s32.totalorder %s1191_s9, %s948_s8  ;;  %p952_p6 = scmp.lt.u32.totalorder %s948_s8, %s1191_s9 }
 0x66f   :  { %p954_p7 = pnand %p952_p6, %p949_p5 }
 0x671   :  { %957 = shalt.err (!%p954_p7)
}
 0x672   :  { %701 = dma.vmem_to_hbm [thread:$0]  %s699_s13, 64, %s1191_s9, [#allocation3]  }
 0x673   :  { %958 = dma.done.wait [#allocation3], 64  }
 0x674   :  { %959 = vsyncadd [#allocation3], 4294967232 }
 0x675   :  { %705 = vsyncpa [#allocation3], 1 }

</bundles_post_ra>
